<compile_context>
chip_gen: v5e
topology: v5e:2x2
jax: 0.10.0
libtpu: 0.0.40
codegen_flags: <defaults>
</compile_context>

<pallas_src>
import functools

import jax
import jax.numpy as jnp
import numpy as np
from jax.experimental import pallas as pl
from jax.experimental.pallas import tpu as pltpu


# ----------------------------- Pallas kernel --------------------------------

def _shell_fused_kernel(cols_ref, wb_ref, bb_ref, wh_ref, bh_ref, o_ref):
    """One (batch, M-tile) step: base conv (as im2col GEMM) + fused 1x1 heads.

    cols_ref: (TM, 9*C_in)      bf16  im2col patches for TM output pixels
    wb_ref  : (9*C_in, C_feat)  bf16  base 3x3 weights, tap-major (kh*3+kw, c)
    bb_ref  : (1, C_feat)       f32
    wh_ref  : (C_feat, C_heads) bf16  concatenated head weights (no padding)
    bh_ref  : (1, C_heads)      f32
    o_ref   : (TM, C_heads)     bf16  all head outputs for this tile
    """
    # base_net: single K=36 MXU pass, fp32 accumulation, bias + ReLU on VPU.
    feats = jnp.dot(cols_ref[...], wb_ref[...],
                    preferred_element_type=jnp.float32)
    feats = jnp.maximum(feats + bb_ref[...], 0.0)

    # head_nets: all 1x1 convs as one matmul on the in-VMEM feats (features
    # never round-trip through HBM between base and heads).
    out = jnp.dot(feats.astype(jnp.bfloat16), wh_ref[...],
                  preferred_element_type=jnp.float32) + bh_ref[...]
    # TODO(synk): fold pairs of pixels into 128-wide rows before the store to
    # get fully unmasked lane-dense vst (currently 36/128 lanes per store).
    o_ref[...] = out.astype(o_ref.dtype)


# ------------------------------ wrapper --------------------------------------

def _pick_tile_m(M, max_rows=8192):
    """Largest divisor of M (multiple of 8) within the row budget."""
    if M <= max_rows:
        return M
    for d in range(max_rows, 7, -1):
        if M % d == 0 and d % 8 == 0:
            return d
    # TODO(synk): ragged M -> pl.cdiv grid with a masked tail tile.
    return M


def shell_forward(x_nchw, params, *, tile_m=None):
    """Shell.forward: x -> base_net(x) -> [head(x) for head in head_nets].

    x_nchw: (N, C_in, H, W) float32. Returns a list of NCHW float32 tensors.
    """
    N, C_in, H, W = x_nchw.shape
    wb, bb = params["base"]                      # (9, C_in, C_feat), (C_feat,)
    C_feat = wb.shape[-1]
    head_dims = [w.shape[1] for (w, _) in params["heads"]]
    C_heads = sum(head_dims)
    K = 9 * C_in
    M = H * W

    TM = tile_m if tile_m is not None else _pick_tile_m(M)
    assert M % TM == 0, "tile_m must divide H*W"
    assert TM == M or TM % 8 == 0, "tile_m must be a multiple of 8 (or H*W)"
    T = M // TM

    # Concatenate all head weights/biases; no dead zero-pad output channels.
    wh = jnp.concatenate([w for (w, _) in params["heads"]], axis=1)
    bh = jnp.concatenate([b for (_, b) in params["heads"]], axis=0)

    # im2col in the wrapper: (N, H*W, 9*C_in) bf16, tap-major (kh*3+kw, c).
    # Folds the 3x3 gather into the lane/contraction axis so the kernel does a
    # single K=36 matmul with no in-kernel halo assembly or relayouts.
    # TODO(synk): on v5e (0.82 TB/s HBM) an in-kernel halo gather would trade
    # these extra input bytes for relayout work; wrapper im2col wins on v6e/v7x.
    x_nhwc = jnp.transpose(x_nchw, (0, 2, 3, 1))
    xp = jnp.pad(x_nhwc, ((0, 0), (1, 1), (1, 1), (0, 0)))
    cols = jnp.concatenate(
        [xp[:, i:i + H, j:j + W, :] for i in range(3) for j in range(3)],
        axis=-1).reshape(N, M, K).astype(jnp.bfloat16)

    out = pl.pallas_call(
        _shell_fused_kernel,
        out_shape=jax.ShapeDtypeStruct((N, M, C_heads), jnp.bfloat16),
        grid=(N, T),
        in_specs=[
            # im2col patch rows for this (batch, M-tile).
            pl.BlockSpec((None, TM, K), lambda n, t: (n, t, 0)),
            # Weights / biases: single full-array blocks, resident every step.
            pl.BlockSpec((K, C_feat), lambda n, t: (0, 0)),
            pl.BlockSpec((1, C_feat), lambda n, t: (0, 0)),
            pl.BlockSpec((C_feat, C_heads), lambda n, t: (0, 0)),
            pl.BlockSpec((1, C_heads), lambda n, t: (0, 0)),
        ],
        out_specs=pl.BlockSpec((None, TM, C_heads), lambda n, t: (n, t, 0)),
        compiler_params=pltpu.CompilerParams(
            dimension_semantics=("parallel", "parallel"),
            vmem_limit_bytes=32 * 1024 * 1024,   # well under v7x's 64 MiB VMEM
        ),
    )(cols,
      wb.reshape(K, C_feat).astype(jnp.bfloat16),
      bb.reshape(1, C_feat).astype(jnp.float32),
      wh.astype(jnp.bfloat16),
      bh.reshape(1, C_heads).astype(jnp.float32))

    # Split per-head channels and restore NCHW f32 for parity with the PyTorch
    # module's output convention.
    # TODO(synk): keep bf16 / NHWC if downstream accepts it (skips the cast and
    # transpose traffic entirely).
    out = out.reshape(N, H, W, C_heads)
    outs, off = [], 0
    for d in head_dims:
        outs.append(jnp.transpose(out[..., off:off + d],
                                  (0, 3, 1, 2)).astype(jnp.float32))
        off += d
    return outs


# -------------------------- params & reference -------------------------------

def make_params(key, c_in=4, c_feat=32, head_channels=(17, 19)):
    """Synthetic parameters matching the module's conv shapes.

    Base conv weight is stored tap-major as (9, C_in, C_feat) — i.e. a PyTorch
    (C_feat, C_in, 3, 3) weight permuted to (kh, kw, C_in, C_feat) and
    reshaped. Head weights are (C_feat, C_out)."""
    k_bw, k_bb, *k_heads = jax.random.split(key, 2 + 2 * len(head_channels))
    w_base = 0.05 * jax.random.normal(k_bw, (9, c_in, c_feat), jnp.float32)
    b_base = 0.01 * jax.random.normal(k_bb, (c_feat,), jnp.float32)
    heads = []
    for i, c_out in enumerate(head_channels):
        kw_, kb_ = k_heads[2 * i], k_heads[2 * i + 1]
        heads.append(
            (0.05 * jax.random.normal(kw_, (c_feat, c_out), jnp.float32),
             0.01 * jax.random.normal(kb_, (c_out,), jnp.float32)))
    return {"base": (w_base, b_base), "heads": heads}


def _reference(x_nchw, params):
    """Pure-JAX fp32 reference (im2col formulation of the same module)."""
    x = jnp.transpose(x_nchw, (0, 2, 3, 1))
    N, H, W, C = x.shape
    wb, bb = params["base"]
    xp = jnp.pad(x, ((0, 0), (1, 1), (1, 1), (0, 0)))
    cols = jnp.concatenate(
        [xp[:, i:i + H, j:j + W, :] for i in range(3) for j in range(3)],
        axis=-1).reshape(N * H * W, 9 * C)
    feats = jnp.maximum(cols @ wb.reshape(9 * C, -1) + bb, 0.0)
    outs = []
    for (w_h, b_h) in params["heads"]:
        y = feats @ w_h + b_h
        outs.append(y.reshape(N, H, W, w_h.shape[1]).transpose(0, 3, 1, 2))
    return outs


# ---------------------------------- main --------------------------------------

if __name__ == "__main__":
    key = jax.random.PRNGKey(0)
    k_x, k_p = jax.random.split(key)

    N, C_in, H, W = 2, 4, 16, 16
    x = jax.random.normal(k_x, (N, C_in, H, W), jnp.float32)
    params = make_params(k_p, c_in=C_in, c_feat=32, head_channels=(17, 19))

    # tile_m=128 -> grid (N=2, T=2): 4 parallel steps, exercises M tiling.
    fwd = jax.jit(functools.partial(shell_forward, tile_m=128))
    outs = fwd(x, params)
    outs = [jax.block_until_ready(o) for o in outs]

    refs = _reference(x, params)
    for o, r in zip(outs, refs):
        assert o.shape == r.shape, (o.shape, r.shape)
        # Kernel uses bf16 MXU operands + bf16 output with fp32 accumulation;
        # compare to the fp32 reference at mixed-precision tolerance.
        np.testing.assert_allclose(np.asarray(o), np.asarray(r),
                                   rtol=1e-2, atol=1e-2)
    print("KERNEL_OK")
</pallas_src>

<mosaic_0001>
module attributes {stable_mosaic.version = 11 : i64} {
  func.func @_shell_fused_kernel(%arg0: i32, %arg1: i32, %arg2: memref<1x128x36xbf16, #tpu.memory_space<vmem>>, %arg3: memref<36x32xbf16, #tpu.memory_space<vmem>>, %arg4: memref<1x32xf32, #tpu.memory_space<vmem>>, %arg5: memref<32x36xbf16, #tpu.memory_space<vmem>>, %arg6: memref<1x36xf32, #tpu.memory_space<vmem>>, %arg7: memref<1x128x36xbf16, #tpu.memory_space<vmem>>) attributes {dimension_semantics = [#tpu.dimension_semantics<parallel>, #tpu.dimension_semantics<parallel>], iteration_bounds = array<i64: 2, 2>, scalar_prefetch = 0 : i64, scratch_operands = 0 : i64, tpu.core_type = #tpu.core_type<tc>, window_params = [{transform_indices = @transform_0, window_bounds = array<i64: 1, 128, 36>}, {pipeline_mode = #tpu.pipeline_mode<synchronous>, transform_indices = @transform_1, window_bounds = array<i64: 36, 32>}, {pipeline_mode = #tpu.pipeline_mode<synchronous>, transform_indices = @transform_2, window_bounds = array<i64: 1, 32>}, {pipeline_mode = #tpu.pipeline_mode<synchronous>, transform_indices = @transform_3, window_bounds = array<i64: 32, 36>}, {pipeline_mode = #tpu.pipeline_mode<synchronous>, transform_indices = @transform_4, window_bounds = array<i64: 1, 36>}, {transform_indices = @transform_5, window_bounds = array<i64: 1, 128, 36>}]} {
    %c0 = arith.constant 0 : index
    %c0_0 = arith.constant 0 : index
    %c0_1 = arith.constant 0 : index
    %0 = vector.load %arg2[%c0, %c0_0, %c0_1] : memref<1x128x36xbf16, #tpu.memory_space<vmem>>, vector<1x128x36xbf16>
    %1 = vector.shape_cast %0 : vector<1x128x36xbf16> to vector<128x36xbf16>
    %c0_2 = arith.constant 0 : index
    %c0_3 = arith.constant 0 : index
    %2 = vector.load %arg3[%c0_2, %c0_3] : memref<36x32xbf16, #tpu.memory_space<vmem>>, vector<36x32xbf16>
    %cst = arith.constant dense<0.000000e+00> : vector<128x32xf32>
    %3 = tpu.matmul %1, %2, %cst {dimension_numbers = #tpu.dot_dimension_numbers<[1], [0], [0], [1], [0, 0, 1, 1], [], []>} : vector<128x36xbf16>, vector<36x32xbf16>, vector<128x32xf32> -> vector<128x32xf32>
    %c0_4 = arith.constant 0 : index
    %c0_5 = arith.constant 0 : index
    %4 = vector.load %arg4[%c0_4, %c0_5] : memref<1x32xf32, #tpu.memory_space<vmem>>, vector<1x32xf32>
    %5 = vector.broadcast %4 : vector<1x32xf32> to vector<128x32xf32>
    %6 = arith.addf %3, %5 : vector<128x32xf32>
    %cst_6 = arith.constant 0.000000e+00 : f32
    %7 = vector.broadcast %cst_6 : f32 to vector<128x32xf32>
    %8 = arith.maximumf %6, %7 : vector<128x32xf32>
    %9 = arith.truncf %8 : vector<128x32xf32> to vector<128x32xbf16>
    %c0_7 = arith.constant 0 : index
    %c0_8 = arith.constant 0 : index
    %10 = vector.load %arg5[%c0_7, %c0_8] : memref<32x36xbf16, #tpu.memory_space<vmem>>, vector<32x36xbf16>
    %cst_9 = arith.constant dense<0.000000e+00> : vector<128x36xf32>
    %11 = tpu.matmul %9, %10, %cst_9 {dimension_numbers = #tpu.dot_dimension_numbers<[1], [0], [0], [1], [0, 0, 1, 1], [], []>} : vector<128x32xbf16>, vector<32x36xbf16>, vector<128x36xf32> -> vector<128x36xf32>
    %c0_10 = arith.constant 0 : index
    %c0_11 = arith.constant 0 : index
    %12 = vector.load %arg6[%c0_10, %c0_11] : memref<1x36xf32, #tpu.memory_space<vmem>>, vector<1x36xf32>
    %13 = vector.broadcast %12 : vector<1x36xf32> to vector<128x36xf32>
    %14 = arith.addf %11, %13 : vector<128x36xf32>
    %15 = arith.truncf %14 : vector<128x36xf32> to vector<128x36xbf16>
    %c0_12 = arith.constant 0 : index
    %c0_13 = arith.constant 0 : index
    %c0_14 = arith.constant 0 : index
    %16 = vector.load %arg7[%c0_12, %c0_13, %c0_14] : memref<1x128x36xbf16, #tpu.memory_space<vmem>>, vector<1x128x36xbf16>
    %17 = vector.shape_cast %16 : vector<1x128x36xbf16> to vector<128x36xbf16>
    %18 = vector.shape_cast %15 : vector<128x36xbf16> to vector<1x128x36xbf16>
    tpu.vector_store %arg7[%c0_12, %c0_13, %c0_14], %18 {strides = array<i32>} : memref<1x128x36xbf16, #tpu.memory_space<vmem>>, vector<1x128x36xbf16>,
    return
  }
  func.func @transform_0(%arg0: i32, %arg1: i32) -> (i32, i32, i32) {
    %c0_i32 = arith.constant 0 : i32
    %c0_i32_0 = arith.constant 0 : i32
    return %arg0, %arg1, %c0_i32 : i32, i32, i32
  }
  func.func @transform_1(%arg0: i32, %arg1: i32) -> (i32, i32) {
    %c0_i32 = arith.constant 0 : i32
    %c0_i32_0 = arith.constant 0 : i32
    %c0_i32_1 = arith.constant 0 : i32
    return %c0_i32, %c0_i32_0 : i32, i32
  }
  func.func @transform_2(%arg0: i32, %arg1: i32) -> (i32, i32) {
    %c0_i32 = arith.constant 0 : i32
    %c0_i32_0 = arith.constant 0 : i32
    %c0_i32_1 = arith.constant 0 : i32
    return %c0_i32, %c0_i32_0 : i32, i32
  }
  func.func @transform_3(%arg0: i32, %arg1: i32) -> (i32, i32) {
    %c0_i32 = arith.constant 0 : i32
    %c0_i32_0 = arith.constant 0 : i32
    %c0_i32_1 = arith.constant 0 : i32
    return %c0_i32, %c0_i32_0 : i32, i32
  }
  func.func @transform_4(%arg0: i32, %arg1: i32) -> (i32, i32) {
    %c0_i32 = arith.constant 0 : i32
    %c0_i32_0 = arith.constant 0 : i32
    %c0_i32_1 = arith.constant 0 : i32
    return %c0_i32, %c0_i32_0 : i32, i32
  }
  func.func @transform_5(%arg0: i32, %arg1: i32) -> (i32, i32, i32) {
    %c0_i32 = arith.constant 0 : i32
    %c0_i32_0 = arith.constant 0 : i32
    return %arg0, %arg1, %c0_i32 : i32, i32, i32
  }
}

</mosaic_0001>

<bundles_post_ra>
// kernel: shell_forward.1
= control target key start
LH: loop header
LB: loop body
LE: loop exit
PB: predicated region body
PF: predicated region fallthrough
CT: control target
= control target key end

     0   :  { %s870_s18 = smov 0   ;;  %s872_s19 = smov 0   ;;  %s1009_s0 = inlined_call_operand.vmem [shape: bf16[2,256,36], index: 0, kind: input, shape index: {}]   ;;  %s1010_s1 = inlined_call_operand.vmem [shape: bf16[36,32], index: 1, kind: input, shape index: {}]   ;;  %s1011_s2 = inlined_call_operand.vmem [shape: f32[1,32], index: 2, kind: input, shape index: {}]   ;;  %s1012_s3 = inlined_call_operand.vmem [shape: bf16[32,36], index: 3, kind: input, shape index: {}]   ;;  %s1013_s4 = inlined_call_operand.vmem [shape: f32[1,36], index: 4, kind: input, shape index: {}]   ;;  %s1014_s5 = inlined_call_operand.vmem [shape: bf16[2,256,36], index: 5, kind: output, shape index: {}]  }
   0x1   :  { %s874_s20 = smov 0   ;;  %s876_s21 = smov 0  }
   0x2   :  { %s878_s22 = smov 0  }
   0x3 LB: > { %s24_s23 = sadd.s32 1, %s830_s20  ;;  %s27_s24 = sadd.s32 1, %s834_s21  ;;  %s838_s22 = sphi %s878_s22, %s15_s22   ;;  %s834_s21 = sphi %s876_s21, %s1018_s21   ;;  %s830_s20 = sphi %s874_s20, %s1017_s20   ;;  %s826_s19 = sphi %s872_s19, %s1016_s19   ;;  %s822_s18 = sphi %s870_s18, %s1015_s18  }
   0x4   : > { %p25_p0 = scmp.ge.s32.totalorder %s24_s23, 2  ;;  %p668_p1 = scmp.ge.s32.totalorder %s838_s22, 1 }
   0x5   : > { %p208_p2 = scmp.lt.s32.totalorder %s838_s22, 5 }
   0x6   : > { %s1020_s23 = smov (%p25_p0, %s24_s23), 0  ;;  %s1022_s24 = smov (!%p25_p0, %s27_s24), %s834_s21 }
   0x7   : > { %p209_p3 = pnand %p668_p1, %p208_p2  ;;  %p29_p4 = scmp.ge.s32.totalorder %s1022_s24, 2 }
   0x8   : > { %s669_s27 = sshll.u32 (!%p209_p3), %s822_s18, 4  ;;  %p245_p5 = scmp.lt.s32.totalorder (!%p209_p3), %s826_s19, 1 }
   0x9   : > { %s1024_s24 = smov (%p29_p4, %s1022_s24), 0  ;;  %212 = sbr.rel (%p209_p3) target bundleno = 374 (0x176), region = 40 }
   0xa   : > { %p247_p6 = scmp.lt.s32.totalorder (!%p209_p3), %s669_s27, 31 }
   0xe   : > { %v285_v0 = vld [vmem:[%s1010_s1 + $0x10] sm:$0x3]  ;;  %vm370_vm0 = vcmask 1041408   ;;  %s1026_s19 = smov (!%p245_p5, %s826_s19), 1  ;;  %s1028_s27 = smov (!%p247_p6, %s669_s27), 31  ;;  %v750_v4 = vld [vmem:[%s1010_s1 + $0x8] sm:$0xff] }
   0xf   : > { %v339_v1 = vunpack.c.l.b16 %v285_v0  ;;  %s670_s28 = sshll.u32 %s1026_s19, 5  ;;  %v749_v5 = vld [vmem:[%s1010_s1] sm:$0xff]  ;;  %vm345_vm1 = vcmask 293888   ;;  %v752_v14 = vld [vmem:[%s1012_s3 + $0x8] sm:$0xff]  ;;  %vm467_vm2 = vcmask 261120   ;;  %vm557_vm3 = vcmask 289792  }
  0x10   : > { %s906_s6 = sadd.s32 %s670_s28, %s1028_s27  ;;  %498 = vmatpush.bf16.msra.mxu1 %v752_v14  ;;  %756 = vmatpush.bf16.msra.mxu3 %v752_v14  ;;  %v751_v15 = vld [vmem:[%s1012_s3] sm:$0xff] }
  0x11   : > { %v342_v2 = vpack.c.b16 %v339_v1, %v339_v1  ;;  %s671_s7 = sshll.u32 %s906_s6, 2  ;;  %v798_v17 = vld [vmem:[%s1011_s2] ss:$0 sm:$0xff] }
  0x12   : > { %s252_s12 = scalar_lea.vmem %s1009_s0, %s671_s7  ;;  %s945_s28 = scalar_lea.vmem %s1014_s5, %s671_s7 }
  0x13   : > { %v372_v3 = vsel %vm370_vm0, %v342_v2, 0  ;;  %v741_v6 = vld [vmem:[%s252_s12] sm:$0xff]  ;;  %v742_v8 = vld [vmem:[%s252_s12 + $0x8] sm:$0xff]  ;;  %v743_v10 = vld [vmem:[%s252_s12 + $0x10] sm:$0xff] }
  0x14   : > { %379 = vmatpush.bf16.msra.mxu0 %v372_v3  ;;  %753 = vmatpush.bf16.msra.mxu2 %v372_v3  ;;  %v745_v7 = vld [vmem:[%s252_s12 + $0x20] sm:$0xff]  ;;  %v746_v9 = vld [vmem:[%s252_s12 + $0x28] sm:$0xff]  ;;  %v747_v11 = vld [vmem:[%s252_s12 + $0x30] sm:$0xff] }
  0x15   : > { %v744_v12 = vld [vmem:[%s252_s12 + $0x18] sm:$0xff]  ;;  %499 = vmatpush.bf16.msra.mxu1 %v751_v15  ;;  %757 = vmatpush.bf16.msra.mxu3 %v751_v15 }
  0x16   : > { %v748_v13 = vld [vmem:[%s252_s12 + $0x38] sm:$0xff] }
  0x18   : > { %380 = vmatpush.bf16.msra.mxu0 %v750_v4  ;;  %754 = vmatpush.bf16.msra.mxu2 %v750_v4 }
  0x1c   : > { %381 = vmatpush.bf16.msra.mxu0 %v749_v5  ;;  %755 = vmatpush.bf16.msra.mxu2 %v749_v5 }
  0x1f   : > { %715 = vmatmul.msk.bf16.vlgmr.msra.gmra.mxu0 %vm345_vm1, %v741_v6  ;;  %719 = vmatmul.msk.bf16.vlgmr.msra.gmra.mxu2 %vm345_vm1, %v745_v7 }
  0x2f   : > { %716 = vmatmul.msk.bf16.gmra.mxu0 %vm345_vm1, %v742_v8  ;;  %720 = vmatmul.msk.bf16.gmra.mxu2 %vm345_vm1, %v746_v9  ;;  %v937_v9 = vld [vmem:[%s1013_s4] ss:$0 sm:$0xff] }
  0x3f   : > { %717 = vmatmul.msk.bf16.gmra.mxu0 %vm345_vm1, %v743_v10  ;;  %721 = vmatmul.msk.bf16.gmra.mxu2 %vm345_vm1, %v747_v11 }
  0x4f   : > { %718 = vmatmul.msk.bf16.gmra.mxu0 %vm345_vm1, %v744_v12  ;;  %722 = vmatmul.msk.bf16.gmra.mxu2 %vm345_vm1, %v748_v13 }
  0x9c   : > { %v383_v16 = vpop.f32.mrf.mxu0 }
  0x9d   : > { %v384_v19 = vadd.f32 %v798_v17, %v383_v16 }
  0x9f   : > { %v423_v23 = vmax.f32 %v384_v19, 0.0 }
  0xa2   : > { %v403_v18 = vpop.f32.mrf.mxu2 }
  0xa3   : > { %v404_v20 = vadd.f32 %v798_v17, %v403_v18 }
  0xa4   : > { %v385_v21 = vpop.f32.mrf.mxu0 }
  0xa5   : > { %v386_v22 = vadd.f32 %v798_v17, %v385_v21  ;;  %v431_v29 = vmax.f32 %v404_v20, 0.0 }
  0xa7   : > { %v424_v24 = vmax.f32 %v386_v22, 0.0 }
  0xa9   : > { %v439_v25 = vpack.c.bf16 %v424_v24, %v423_v23 }
  0xaa   : > { %v405_v26 = vpop.f32.mrf.mxu2 }
  0xab   : > { %v406_v27 = vadd.f32 %v798_v17, %v405_v26  ;;  %731 = vmatmul.msk.bf16.vlgmr.msra.gmra.mxu1 %vm467_vm2, %v439_v25 }
  0xac   : > { %v388_v28 = vpop.f32.mrf.mxu0 }
  0xad   : > { %v432_v30 = vmax.f32 %v406_v27, 0.0  ;;  %v389_v33 = vadd.f32 %v798_v17, %v388_v28 }
  0xaf   : > { %v443_v31 = vpack.c.bf16 %v432_v30, %v431_v29  ;;  %v425_v36 = vmax.f32 %v389_v33, 0.0 }
  0xb2   : > { %v408_v32 = vpop.f32.mrf.mxu2 }
  0xb3   : > { %v409_v38 = vadd.f32 %v798_v17, %v408_v32 }
  0xb4   : > { %v390_v34 = vpop.f32.mrf.mxu0 }
  0xb5   : > { %v391_v35 = vadd.f32 %v798_v17, %v390_v34  ;;  %v433_v43 = vmax.f32 %v409_v38, 0.0 }
  0xb7   : > { %v426_v37 = vmax.f32 %v391_v35, 0.0 }
  0xb9   : > { %v440_v39 = vpack.c.bf16 %v426_v37, %v425_v36 }
  0xba   : > { %v410_v40 = vpop.f32.mrf.mxu2 }
  0xbb   : > { %v411_v41 = vadd.f32 %v798_v17, %v410_v40  ;;  %732 = vmatmul.msk.bf16.gmra.mxu1 %vm467_vm2, %v440_v39 }
  0xbc   : > { %v393_v42 = vpop.f32.mrf.mxu0 }
  0xbd   : > { %v434_v44 = vmax.f32 %v411_v41, 0.0  ;;  %v394_v47 = vadd.f32 %v798_v17, %v393_v42 }
  0xbf   : > { %v444_v45 = vpack.c.bf16 %v434_v44, %v433_v43  ;;  %v427_v50 = vmax.f32 %v394_v47, 0.0 }
  0xc1   : > { %736 = vmatmul.msk.bf16.vlgmr.msra.gmra.mxu3 %vm467_vm2, %v444_v45 }
  0xc2   : > { %v413_v46 = vpop.f32.mrf.mxu2 }
  0xc3   : > { %v414_v52 = vadd.f32 %v798_v17, %v413_v46 }
  0xc4   : > { %v395_v48 = vpop.f32.mrf.mxu0 }
  0xc5   : > { %v396_v49 = vadd.f32 %v798_v17, %v395_v48  ;;  %v435_v57 = vmax.f32 %v414_v52, 0.0 }
  0xc7   : > { %v428_v51 = vmax.f32 %v396_v49, 0.0 }
  0xc9   : > { %v441_v53 = vpack.c.bf16 %v428_v51, %v427_v50 }
  0xca   : > { %v415_v54 = vpop.f32.mrf.mxu2 }
  0xcb   : > { %v416_v55 = vadd.f32 %v798_v17, %v415_v54  ;;  %733 = vmatmul.msk.bf16.gmra.mxu1 %vm467_vm2, %v441_v53 }
  0xcc   : > { %v398_v56 = vpop.f32.mrf.mxu0 }
  0xcd   : > { %v436_v58 = vmax.f32 %v416_v55, 0.0  ;;  %v399_v61 = vadd.f32 %v798_v17, %v398_v56 }
  0xcf   : > { %v445_v59 = vpack.c.bf16 %v436_v58, %v435_v57  ;;  %v429_v0 = vmax.f32 %v399_v61, 0.0 }
  0xd1   : > { %737 = vmatmul.msk.bf16.gmra.mxu3 %vm467_vm2, %v445_v59 }
  0xd2   : > { %v418_v60 = vpop.f32.mrf.mxu2 }
  0xd3   : > { %v419_v2 = vadd.f32 %v798_v17, %v418_v60 }
  0xd4   : > { %v400_v62 = vpop.f32.mrf.mxu0 }
  0xd5   : > { %v401_v63 = vadd.f32 %v798_v17, %v400_v62  ;;  %v437_v6 = vmax.f32 %v419_v2, 0.0 }
  0xd7   : > { %v430_v1 = vmax.f32 %v401_v63, 0.0 }
  0xd9   : > { %v442_v3 = vpack.c.bf16 %v430_v1, %v429_v0 }
  0xda   : > { %v420_v4 = vpop.f32.mrf.mxu2 }
  0xdb   : > { %v421_v5 = vadd.f32 %v798_v17, %v420_v4  ;;  %734 = vmatmul.msk.bf16.gmra.mxu1 %vm467_vm2, %v442_v3 }
  0xdd   : > { %v438_v7 = vmax.f32 %v421_v5, 0.0 }
  0xdf   : > { %v446_v8 = vpack.c.bf16 %v438_v7, %v437_v6 }
  0xe1   : > { %738 = vmatmul.msk.bf16.gmra.mxu3 %vm467_vm2, %v446_v8 }
  0xeb   : > { %735 = vmatmul.msk.bf16.gmra.mxu1 %vm467_vm2, %v443_v31 }
 0x128   : > { %v501_v10 = vpop.f32.mrf.mxu1 }
 0x129   : > { %v502_v11 = vadd.f32 %v937_v9, %v501_v10 }
 0x12b   : > { %v541_v12 = vpack.c.bf16 %v502_v11, %v502_v11 }
 0x12d   : > { %558 = vst.msk [vmem:[%s945_s28] sm:$0xf] %vm557_vm3, %v541_v12 }
 0x130   : > { %v503_v13 = vpop.f32.mrf.mxu1 }
 0x131   : > { %v504_v14 = vadd.f32 %v937_v9, %v503_v13 }
 0x133   : > { %v542_v15 = vpack.c.bf16 %v504_v14, %v504_v14 }
 0x135   : > { %559 = vst.msk [vmem:[%s945_s28 + $0x4] sm:$0xf] %vm557_vm3, %v542_v15 }
 0x138   : > { %v506_v16 = vpop.f32.mrf.mxu1 }
 0x139   : > { %v507_v17 = vadd.f32 %v937_v9, %v506_v16 }
 0x13b   : > { %v543_v18 = vpack.c.bf16 %v507_v17, %v507_v17 }
 0x13d   : > { %560 = vst.msk [vmem:[%s945_s28 + $0x8] sm:$0xf] %vm557_vm3, %v543_v18 }
 0x140   : > { %v508_v19 = vpop.f32.mrf.mxu1 }
 0x141   : > { %v509_v20 = vadd.f32 %v937_v9, %v508_v19 }
 0x143   : > { %v544_v21 = vpack.c.bf16 %v509_v20, %v509_v20 }
 0x144   : > { %v526_v22 = vpop.f32.mrf.mxu3 }
 0x145   : > { %561 = vst.msk [vmem:[%s945_s28 + $0xc] sm:$0xf] %vm557_vm3, %v544_v21  ;;  %v527_v23 = vadd.f32 %v937_v9, %v526_v22 }
 0x147   : > { %v551_v24 = vpack.c.bf16 %v527_v23, %v527_v23 }
 0x148   : > { %v511_v25 = vpop.f32.mrf.mxu1 }
 0x149   : > { %568 = vst.msk [vmem:[%s945_s28 + $0x28] sm:$0xf] %vm557_vm3, %v551_v24  ;;  %v512_v26 = vadd.f32 %v937_v9, %v511_v25 }
 0x14b   : > { %v545_v27 = vpack.c.bf16 %v512_v26, %v512_v26 }
 0x14c   : > { %v528_v28 = vpop.f32.mrf.mxu3 }
 0x14d   : > { %562 = vst.msk [vmem:[%s945_s28 + $0x10] sm:$0xf] %vm557_vm3, %v545_v27  ;;  %v529_v29 = vadd.f32 %v937_v9, %v528_v28 }
 0x14f   : > { %v552_v30 = vpack.c.bf16 %v529_v29, %v529_v29 }
 0x150   : > { %v513_v31 = vpop.f32.mrf.mxu1 }
 0x151   : > { %569 = vst.msk [vmem:[%s945_s28 + $0x2c] sm:$0xf] %vm557_vm3, %v552_v30  ;;  %v514_v32 = vadd.f32 %v937_v9, %v513_v31 }
 0x153   : > { %v546_v33 = vpack.c.bf16 %v514_v32, %v514_v32 }
 0x154   : > { %v531_v34 = vpop.f32.mrf.mxu3 }
 0x155   : > { %563 = vst.msk [vmem:[%s945_s28 + $0x14] sm:$0xf] %vm557_vm3, %v546_v33  ;;  %v532_v35 = vadd.f32 %v937_v9, %v531_v34 }
 0x157   : > { %v553_v36 = vpack.c.bf16 %v532_v35, %v532_v35 }
 0x158   : > { %v516_v37 = vpop.f32.mrf.mxu1 }
 0x159   : > { %570 = vst.msk [vmem:[%s945_s28 + $0x30] sm:$0xf] %vm557_vm3, %v553_v36  ;;  %v517_v38 = vadd.f32 %v937_v9, %v516_v37 }
 0x15b   : > { %v547_v39 = vpack.c.bf16 %v517_v38, %v517_v38 }
 0x15c   : > { %v533_v40 = vpop.f32.mrf.mxu3 }
 0x15d   : > { %564 = vst.msk [vmem:[%s945_s28 + $0x18] sm:$0xf] %vm557_vm3, %v547_v39  ;;  %v534_v41 = vadd.f32 %v937_v9, %v533_v40 }
 0x15f   : > { %v554_v42 = vpack.c.bf16 %v534_v41, %v534_v41 }
 0x160   : > { %v518_v43 = vpop.f32.mrf.mxu1 }
 0x161   : > { %571 = vst.msk [vmem:[%s945_s28 + $0x34] sm:$0xf] %vm557_vm3, %v554_v42  ;;  %v519_v44 = vadd.f32 %v937_v9, %v518_v43 }
 0x163   : > { %v548_v45 = vpack.c.bf16 %v519_v44, %v519_v44 }
 0x164   : > { %v536_v46 = vpop.f32.mrf.mxu3 }
 0x165   : > { %565 = vst.msk [vmem:[%s945_s28 + $0x1c] sm:$0xf] %vm557_vm3, %v548_v45  ;;  %v537_v47 = vadd.f32 %v937_v9, %v536_v46 }
 0x167   : > { %v555_v48 = vpack.c.bf16 %v537_v47, %v537_v47 }
 0x168   : > { %v521_v49 = vpop.f32.mrf.mxu1 }
 0x169   : > { %572 = vst.msk [vmem:[%s945_s28 + $0x38] sm:$0xf] %vm557_vm3, %v555_v48  ;;  %v522_v50 = vadd.f32 %v937_v9, %v521_v49 }
 0x16b   : > { %v549_v51 = vpack.c.bf16 %v522_v50, %v522_v50 }
 0x16c   : > { %v538_v52 = vpop.f32.mrf.mxu3 }
 0x16d   : > { %566 = vst.msk [vmem:[%s945_s28 + $0x20] sm:$0xf] %vm557_vm3, %v549_v51  ;;  %v539_v53 = vadd.f32 %v937_v9, %v538_v52 }
 0x16f   : > { %v556_v54 = vpack.c.bf16 %v539_v53, %v539_v53 }
 0x170   : > { %v523_v55 = vpop.f32.mrf.mxu1 }
 0x171   : > { %573 = vst.msk [vmem:[%s945_s28 + $0x3c] sm:$0xf] %vm557_vm3, %v556_v54  ;;  %v524_v56 = vadd.f32 %v937_v9, %v523_v55 }
 0x173   : > { %v550_v57 = vpack.c.bf16 %v524_v56, %v524_v56 }
 0x175   : > { %567 = vst.msk [vmem:[%s945_s28 + $0x24] sm:$0xf] %vm557_vm3, %v550_v57 }
 0x176 PF: > { %s15_s22 = sadd.s32 1, %s838_s22   ;;  %s1015_s18 = smov %s830_s20 }
 0x177   : > { %p12_p7 = scmp.ge.s32.totalorder %s15_s22, 6   ;;  %s1016_s19 = smov %s834_s21 }
 0x178   : > { %s1017_s20 = smov %s1020_s23  ;;  %s1018_s21 = smov %s1024_s24 }
 0x179   :  { %14 = sbr.rel (!%p12_p7) target bundleno = 3 (0x3), region = 70 }

</bundles_post_ra>
